<compile_context>
chip_gen: v6e
topology: v6e:2x2x1
jax: 0.10.0
libtpu: 0.0.40
codegen_flags: <defaults>
</compile_context>

<pallas_src>
import jax
import jax.numpy as jnp
from jax import lax
from jax.experimental import pallas as pl
from jax.experimental.pallas import tpu as pltpu


def _round_up(a, b):
    return ((a + b - 1) // b) * b


def _make_kernel(use_residuals: bool, num_repeats: int):
    """Block shapes seen by the kernel:
         x_ref : (C, T)          activation tile (streaming dtype, e.g. bf16)
         w1_ref: (R, C//2, C)    folded conv1+BN weights (streaming dtype)
         b1_ref: (R, C//2, 1)    folded bias (f32)
         w2_ref: (R, C, C//2)
         b2_ref: (R, C, 1)
         o_ref : (C, T)
    """

    def kernel(x_ref, w1_ref, b1_ref, w2_ref, b2_ref, o_ref):
        x0 = x_ref[...]                                    # (C, T)

        def repeat_body(r, cur):
            # conv1x1 (C -> C/2) + folded BN, LeakyReLU(0.1)
            h = jnp.dot(w1_ref[r], cur,
                        preferred_element_type=jnp.float32) + b1_ref[r]
            h = jnp.maximum(h, 0.1 * h)                    # LeakyReLU: mul+max
            # conv1x1 (C/2 -> C) + folded BN, LeakyReLU(0.1)
            y = jnp.dot(w2_ref[r], h.astype(w2_ref.dtype),
                        preferred_element_type=jnp.float32) + b2_ref[r]
            y = jnp.maximum(y, 0.1 * y)
            if use_residuals:
                y = y + cur.astype(jnp.float32)
            return y.astype(x_ref.dtype)

        if num_repeats == 1:
            cur = repeat_body(0, x0)
        else:
            # fori_loop (not a static Python unroll) bounds live ranges across
            # repeats; unroll small trip counts for LLO scheduler visibility.
            cur = lax.fori_loop(0, num_repeats, repeat_body, x0,
                                unroll=(num_repeats <= 4))
        o_ref[...] = cur.astype(o_ref.dtype)

    return kernel


def _build_call(N, C, Ch, R, tile_hw, hw_pad, act_dtype, use_residuals,
                vmem_limit_bytes, weight_pipeline_mode):
    wkw = ({} if weight_pipeline_mode is None
           else {"pipeline_mode": weight_pipeline_mode})
    grid = (N, hw_pad // tile_hw)
    return pl.pallas_call(
        _make_kernel(use_residuals, R),
        out_shape=jax.ShapeDtypeStruct((N * C, hw_pad), act_dtype),
        grid_spec=pltpu.PrefetchScalarGridSpec(
            num_scalar_prefetch=0,
            grid=grid,
            in_specs=[
                # activation tile: rows [n*C, (n+1)*C), lanes [j*T, (j+1)*T)
                pl.BlockSpec((C, tile_hw), lambda n, j: (n, j)),
                # weights/biases: full arrays, constant block index
                pl.BlockSpec((R, Ch, C), lambda n, j: (0, 0, 0), **wkw),
                pl.BlockSpec((R, Ch, 1), lambda n, j: (0, 0, 0), **wkw),
                pl.BlockSpec((R, C, Ch), lambda n, j: (0, 0, 0), **wkw),
                pl.BlockSpec((R, C, 1), lambda n, j: (0, 0, 0), **wkw),
            ],
            out_specs=pl.BlockSpec((C, tile_hw), lambda n, j: (n, j)),
        ),
        compiler_params=pltpu.CompilerParams(
            dimension_semantics=("parallel", "parallel"),
            vmem_limit_bytes=vmem_limit_bytes),
    )


def residual_block_pallas(x_nchw, w1, b1, w2, b2, *, use_residuals=True,
                          max_tile_hw=16384):
    """Fused ResidualBlock forward.

    x_nchw: (N, C, H, W)  activations (bf16 recommended for HBM bandwidth).
    w1: (R, C//2, C)  folded conv1+BN weights   b1: (R, C//2)
    w2: (R, C, C//2)  folded conv2+BN weights   b2: (R, C)
    """
    N, C, H, W = x_nchw.shape
    R, Ch, C_in = w1.shape
    assert C_in == C and Ch == C // 2
    act_dtype = x_nchw.dtype
    act_bytes = jnp.dtype(act_dtype).itemsize
    min_sublane = {4: 8, 2: 16, 1: 32}[act_bytes]
    assert C % min_sublane == 0, (
        f"channels must be a multiple of {min_sublane} for {act_dtype} tiles")
    HW = H * W

    # Native layout, zero-copy reshape: (N, C, H, W) -> (N*C, H*W).
    x_slab = x_nchw.reshape(N * C, HW)

    # ---- VMEM-budget-driven lane tile (multiple of 128) ----
    # Resident weights (single-buffered) + per-lane-column cost of
    # double-buffered in/out act tiles and the f32 intermediates.
    weight_bytes = R * 2 * Ch * C * act_bytes + R * (C + Ch) * 4
    per_col_bytes = C * (4 * act_bytes + 10)
    tile_budget = 28 * 1024 * 1024
    budget_cols = max(
        128, (tile_budget - min(weight_bytes, tile_budget // 2)) // per_col_bytes)
    tile_hw = min(max_tile_hw, _round_up(HW, 128), (budget_cols // 128) * 128)
    tile_hw = max(tile_hw, 128)

    # v7x has 2 TensorCores: guarantee >= 2 grid steps when N == 1 by
    # splitting the spatial axis (no effect on v5e/v6e correctness).
    if N == 1:
        hw128 = _round_up(HW, 128)
        if hw128 >= 256 and tile_hw >= hw128:
            tile_hw = max(128, ((hw128 // 2) // 128) * 128)

    hw_pad = _round_up(HW, tile_hw)
    if hw_pad != HW:
        # TODO(synk): callers with 128-aligned H*W avoid this pad and the
        # post-call slice copy entirely.
        x_slab = jnp.pad(x_slab, ((0, 0), (0, hw_pad - HW)))

    # Weights in the streaming dtype (bf16 MXU fast path); biases stay f32.
    w1c = w1.astype(act_dtype)
    w2c = w2.astype(act_dtype)
    b1c = b1.reshape(R, Ch, 1).astype(jnp.float32)
    b2c = b2.reshape(R, C, 1).astype(jnp.float32)

    # Explicit scoped-VMEM limit: enough for the chosen tiles, capped at
    # 56 MiB so it is still valid on v7x's 64 MiB physical VMEM.
    vmem_limit = int(min(56 * 2**20,
                         max(32 * 2**20,
                             weight_bytes + 3 * per_col_bytes * tile_hw)))

    try:
        call = _build_call(N, C, Ch, R, tile_hw, hw_pad, act_dtype,
                           use_residuals, vmem_limit,
                           pl.Buffered(buffer_count=1))
        out_slab = call(x_slab, w1c, b1c, w2c, b2c)
    except Exception:
        # Fallback if pipeline_mode single-buffering is unavailable here.
        call = _build_call(N, C, Ch, R, tile_hw, hw_pad, act_dtype,
                           use_residuals, vmem_limit, None)
        out_slab = call(x_slab, w1c, b1c, w2c, b2c)

    if hw_pad != HW:
        out_slab = out_slab[:, :HW]
    return out_slab.reshape(N, C, H, W)


def _fold_bn(conv_w, gamma, beta, mean, var, eps=1e-5):
    """Fold eval-mode BatchNorm into a 1x1 conv.
    conv_w: (C_out, C_in). Returns W_eff (C_out, C_in) [left-multiply layout],
    b_eff (C_out,)."""
    scale = gamma / jnp.sqrt(var + eps)
    w_eff = conv_w * scale[:, None]
    b_eff = beta - mean * scale
    return w_eff.astype(jnp.float32), b_eff.astype(jnp.float32)


def _reference(x_nchw, w1, b1, w2, b2, use_residuals=True):
    """Pure-JAX mirror of the kernel (same dtype hand-offs)."""
    N, C, H, W = x_nchw.shape
    R, Ch, _ = w1.shape
    dt = x_nchw.dtype
    cur = x_nchw.reshape(N, C, H * W)
    w1c = w1.astype(dt).astype(jnp.float32)
    w2c = w2.astype(dt).astype(jnp.float32)
    b1c = b1.reshape(R, Ch, 1).astype(jnp.float32)
    b2c = b2.reshape(R, C, 1).astype(jnp.float32)
    for r in range(R):
        h = jnp.einsum("oc,ncs->nos", w1c[r], cur.astype(jnp.float32)) + b1c[r]
        h = jnp.maximum(h, 0.1 * h)
        h = h.astype(dt).astype(jnp.float32)      # mirror bf16 hand-off
        y = jnp.einsum("co,nos->ncs", w2c[r], h) + b2c[r]
        y = jnp.maximum(y, 0.1 * y)
        if use_residuals:
            y = y + cur.astype(jnp.float32)
        cur = y.astype(dt)
    return cur.reshape(N, C, H, W)


if __name__ == "__main__":
    # ResidualBlock(channels=64, use_residuals=True, num_repeats=1)
    N, C, H, W = 2, 64, 16, 16
    Ch = C // 2

    key = jax.random.PRNGKey(0)
    ks = jax.random.split(key, 21)

    # Activations streamed in bf16 (halves HBM traffic on this mem-bound op).
    x = jax.random.normal(ks[0], (N, C, H, W), dtype=jnp.float32).astype(jnp.bfloat16)

    def make_repeat(keys):
        # CNNBlock 1: Conv2d(C, C//2, k=1, bias=False) + BatchNorm2d(C//2)
        w1 = jax.random.normal(keys[0], (Ch, C), jnp.float32) / jnp.sqrt(1.0 * C)
        g1 = 1.0 + 0.1 * jax.random.normal(keys[1], (Ch,), jnp.float32)
        be1 = 0.1 * jax.random.normal(keys[2], (Ch,), jnp.float32)
        m1 = 0.1 * jax.random.normal(keys[3], (Ch,), jnp.float32)
        v1 = jnp.abs(1.0 + 0.1 * jax.random.normal(keys[4], (Ch,), jnp.float32))
        # CNNBlock 2: Conv2d(C//2, C, k=1, bias=False) + BatchNorm2d(C)
        w2 = jax.random.normal(keys[5], (C, Ch), jnp.float32) / jnp.sqrt(1.0 * Ch)
        g2 = 1.0 + 0.1 * jax.random.normal(keys[6], (C,), jnp.float32)
        be2 = 0.1 * jax.random.normal(keys[7], (C,), jnp.float32)
        m2 = 0.1 * jax.random.normal(keys[8], (C,), jnp.float32)
        v2 = jnp.abs(1.0 + 0.1 * jax.random.normal(keys[9], (C,), jnp.float32))
        w1f, b1f = _fold_bn(w1, g1, be1, m1, v1)
        w2f, b2f = _fold_bn(w2, g2, be2, m2, v2)
        return w1f, b1f, w2f, b2f

    r0 = make_repeat(ks[1:11])

    # --- module semantics: only the first repeat runs (return inside loop) ---
    w1 = jnp.stack([r0[0]]); b1 = jnp.stack([r0[1]])
    w2 = jnp.stack([r0[2]]); b2 = jnp.stack([r0[3]])

    out = jax.block_until_ready(
        residual_block_pallas(x, w1, b1, w2, b2, use_residuals=True))
    ref = _reference(x, w1, b1, w2, b2, use_residuals=True)
    assert out.shape == (N, C, H, W) and out.dtype == x.dtype
    assert jnp.allclose(out.astype(jnp.float32), ref.astype(jnp.float32),
                        atol=3e-2, rtol=3e-2), "mismatch vs reference (residual)"

    # --- non-residual static variant (no post-hoc subtraction) ---
    out_nr = jax.block_until_ready(
        residual_block_pallas(x, w1, b1, w2, b2, use_residuals=False))
    ref_nr = _reference(x, w1, b1, w2, b2, use_residuals=False)
    assert jnp.allclose(out_nr.astype(jnp.float32), ref_nr.astype(jnp.float32),
                        atol=3e-2, rtol=3e-2), "mismatch vs reference (no residual)"

    # --- fused multi-repeat capability check (single pass over HBM) ---
    r1 = make_repeat(ks[11:21])
    w1s = jnp.stack([r0[0], r1[0]]); b1s = jnp.stack([r0[1], r1[1]])
    w2s = jnp.stack([r0[2], r1[2]]); b2s = jnp.stack([r0[3], r1[3]])
    out2 = jax.block_until_ready(
        residual_block_pallas(x, w1s, b1s, w2s, b2s, use_residuals=True))
    ref2 = _reference(x, w1s, b1s, w2s, b2s, use_residuals=True)
    assert jnp.allclose(out2.astype(jnp.float32), ref2.astype(jnp.float32),
                        atol=3e-2, rtol=3e-2), "mismatch vs reference (fused R=2)"

    # --- N=1 path exercises the dual-TensorCore grid split ---
    out1 = jax.block_until_ready(
        residual_block_pallas(x[:1], w1, b1, w2, b2, use_residuals=True))
    ref1 = _reference(x[:1], w1, b1, w2, b2, use_residuals=True)
    assert jnp.allclose(out1.astype(jnp.float32), ref1.astype(jnp.float32),
                        atol=3e-2, rtol=3e-2), "mismatch vs reference (N=1 split)"

    print("KERNEL_OK")
</pallas_src>

<mosaic_0001>
module attributes {stable_mosaic.version = 11 : i64} {
  func.func @kernel(%arg0: i32, %arg1: i32, %arg2: memref<64x256xbf16, #tpu.memory_space<vmem>>, %arg3: memref<1x32x64xbf16, #tpu.memory_space<vmem>>, %arg4: memref<1x32x1xf32, #tpu.memory_space<vmem>>, %arg5: memref<1x64x32xbf16, #tpu.memory_space<vmem>>, %arg6: memref<1x64x1xf32, #tpu.memory_space<vmem>>, %arg7: memref<64x256xbf16, #tpu.memory_space<vmem>>) attributes {dimension_semantics = [#tpu.dimension_semantics<parallel>, #tpu.dimension_semantics<parallel>], iteration_bounds = array<i64: 2, 1>, scalar_prefetch = 0 : i64, scratch_operands = 0 : i64, tpu.core_type = #tpu.core_type<tc>, window_params = [{transform_indices = @transform_0, window_bounds = array<i64: 64, 256>}, {pipeline_mode = #tpu.pipeline_mode<synchronous>, transform_indices = @transform_1, window_bounds = array<i64: 1, 32, 64>}, {pipeline_mode = #tpu.pipeline_mode<synchronous>, transform_indices = @transform_2, window_bounds = array<i64: 1, 32, 1>}, {pipeline_mode = #tpu.pipeline_mode<synchronous>, transform_indices = @transform_3, window_bounds = array<i64: 1, 64, 32>}, {pipeline_mode = #tpu.pipeline_mode<synchronous>, transform_indices = @transform_4, window_bounds = array<i64: 1, 64, 1>}, {transform_indices = @transform_5, window_bounds = array<i64: 64, 256>}]} {
    %c0 = arith.constant 0 : index
    %c0_0 = arith.constant 0 : index
    %0 = vector.load %arg2[%c0, %c0_0] : memref<64x256xbf16, #tpu.memory_space<vmem>>, vector<64x256xbf16>
    %c0_1 = arith.constant 0 : index
    %c0_2 = arith.constant 0 : index
    %c0_3 = arith.constant 0 : index
    %1 = vector.load %arg3[%c0_1, %c0_2, %c0_3] : memref<1x32x64xbf16, #tpu.memory_space<vmem>>, vector<1x32x64xbf16>
    %2 = vector.shape_cast %1 : vector<1x32x64xbf16> to vector<32x64xbf16>
    %cst = arith.constant dense<0.000000e+00> : vector<32x256xf32>
    %3 = tpu.matmul %2, %0, %cst {dimension_numbers = #tpu.dot_dimension_numbers<[1], [0], [0], [1], [0, 0, 1, 1], [], []>} : vector<32x64xbf16>, vector<64x256xbf16>, vector<32x256xf32> -> vector<32x256xf32>
    %c0_4 = arith.constant 0 : index
    %c0_5 = arith.constant 0 : index
    %c0_6 = arith.constant 0 : index
    %4 = vector.load %arg4[%c0_4, %c0_5, %c0_6] : memref<1x32x1xf32, #tpu.memory_space<vmem>>, vector<1x32x1xf32>
    %5 = vector.shape_cast %4 : vector<1x32x1xf32> to vector<32x1xf32>
    %6 = vector.broadcast %5 : vector<32x1xf32> to vector<32x256xf32>
    %7 = arith.addf %3, %6 : vector<32x256xf32>
    %cst_7 = arith.constant 1.000000e-01 : f32
    %8 = vector.broadcast %cst_7 : f32 to vector<32x256xf32>
    %9 = arith.mulf %8, %7 : vector<32x256xf32>
    %10 = arith.maximumf %7, %9 : vector<32x256xf32>
    %c0_8 = arith.constant 0 : index
    %c0_9 = arith.constant 0 : index
    %c0_10 = arith.constant 0 : index
    %11 = vector.load %arg5[%c0_8, %c0_9, %c0_10] : memref<1x64x32xbf16, #tpu.memory_space<vmem>>, vector<1x64x32xbf16>
    %12 = vector.shape_cast %11 : vector<1x64x32xbf16> to vector<64x32xbf16>
    %13 = arith.truncf %10 : vector<32x256xf32> to vector<32x256xbf16>
    %cst_11 = arith.constant dense<0.000000e+00> : vector<64x256xf32>
    %14 = tpu.matmul %12, %13, %cst_11 {dimension_numbers = #tpu.dot_dimension_numbers<[1], [0], [0], [1], [0, 0, 1, 1], [], []>} : vector<64x32xbf16>, vector<32x256xbf16>, vector<64x256xf32> -> vector<64x256xf32>
    %c0_12 = arith.constant 0 : index
    %c0_13 = arith.constant 0 : index
    %c0_14 = arith.constant 0 : index
    %15 = vector.load %arg6[%c0_12, %c0_13, %c0_14] : memref<1x64x1xf32, #tpu.memory_space<vmem>>, vector<1x64x1xf32>
    %16 = vector.shape_cast %15 : vector<1x64x1xf32> to vector<64x1xf32>
    %17 = vector.broadcast %16 : vector<64x1xf32> to vector<64x256xf32>
    %18 = arith.addf %14, %17 : vector<64x256xf32>
    %cst_15 = arith.constant 1.000000e-01 : f32
    %19 = vector.broadcast %cst_15 : f32 to vector<64x256xf32>
    %20 = arith.mulf %19, %18 : vector<64x256xf32>
    %21 = arith.maximumf %18, %20 : vector<64x256xf32>
    %22 = arith.extf %0 : vector<64x256xbf16> to vector<64x256xf32>
    %23 = arith.addf %21, %22 : vector<64x256xf32>
    %24 = arith.truncf %23 : vector<64x256xf32> to vector<64x256xbf16>
    %c0_16 = arith.constant 0 : index
    %c0_17 = arith.constant 0 : index
    %25 = vector.load %arg7[%c0_16, %c0_17] : memref<64x256xbf16, #tpu.memory_space<vmem>>, vector<64x256xbf16>
    tpu.vector_store %arg7[%c0_16, %c0_17], %24 {strides = array<i32>} : memref<64x256xbf16, #tpu.memory_space<vmem>>, vector<64x256xbf16>,
    return
  }
  func.func @transform_0(%arg0: i32, %arg1: i32) -> (i32, i32) {
    %c0_i32 = arith.constant 0 : i32
    return %arg0, %arg1 : i32, i32
  }
  func.func @transform_1(%arg0: i32, %arg1: i32) -> (i32, i32, i32) {
    %c0_i32 = arith.constant 0 : i32
    %c0_i32_0 = arith.constant 0 : i32
    %c0_i32_1 = arith.constant 0 : i32
    %c0_i32_2 = arith.constant 0 : i32
    return %c0_i32, %c0_i32_0, %c0_i32_1 : i32, i32, i32
  }
  func.func @transform_2(%arg0: i32, %arg1: i32) -> (i32, i32, i32) {
    %c0_i32 = arith.constant 0 : i32
    %c0_i32_0 = arith.constant 0 : i32
    %c0_i32_1 = arith.constant 0 : i32
    %c0_i32_2 = arith.constant 0 : i32
    return %c0_i32, %c0_i32_0, %c0_i32_1 : i32, i32, i32
  }
  func.func @transform_3(%arg0: i32, %arg1: i32) -> (i32, i32, i32) {
    %c0_i32 = arith.constant 0 : i32
    %c0_i32_0 = arith.constant 0 : i32
    %c0_i32_1 = arith.constant 0 : i32
    %c0_i32_2 = arith.constant 0 : i32
    return %c0_i32, %c0_i32_0, %c0_i32_1 : i32, i32, i32
  }
  func.func @transform_4(%arg0: i32, %arg1: i32) -> (i32, i32, i32) {
    %c0_i32 = arith.constant 0 : i32
    %c0_i32_0 = arith.constant 0 : i32
    %c0_i32_1 = arith.constant 0 : i32
    %c0_i32_2 = arith.constant 0 : i32
    return %c0_i32, %c0_i32_0, %c0_i32_1 : i32, i32, i32
  }
  func.func @transform_5(%arg0: i32, %arg1: i32) -> (i32, i32) {
    %c0_i32 = arith.constant 0 : i32
    return %arg0, %arg1 : i32, i32
  }
}

module attributes {stable_mosaic.version = 11 : i64} {
  func.func @kernel(%arg0: i32, %arg1: i32, %arg2: memref<64x256xbf16, #tpu.memory_space<vmem>>, %arg3: memref<1x32x64xbf16, #tpu.memory_space<vmem>>, %arg4: memref<1x32x1xf32, #tpu.memory_space<vmem>>, %arg5: memref<1x64x32xbf16, #tpu.memory_space<vmem>>, %arg6: memref<1x64x1xf32, #tpu.memory_space<vmem>>, %arg7: memref<64x256xbf16, #tpu.memory_space<vmem>>) attributes {dimension_semantics = [#tpu.dimension_semantics<parallel>, #tpu.dimension_semantics<parallel>], iteration_bounds = array<i64: 2, 1>, scalar_prefetch = 0 : i64, scratch_operands = 0 : i64, tpu.core_type = #tpu.core_type<tc>, window_params = [{transform_indices = @transform_0, window_bounds = array<i64: 64, 256>}, {pipeline_mode = #tpu.pipeline_mode<synchronous>, transform_indices = @transform_1, window_bounds = array<i64: 1, 32, 64>}, {pipeline_mode = #tpu.pipeline_mode<synchronous>, transform_indices = @transform_2, window_bounds = array<i64: 1, 32, 1>}, {pipeline_mode = #tpu.pipeline_mode<synchronous>, transform_indices = @transform_3, window_bounds = array<i64: 1, 64, 32>}, {pipeline_mode = #tpu.pipeline_mode<synchronous>, transform_indices = @transform_4, window_bounds = array<i64: 1, 64, 1>}, {transform_indices = @transform_5, window_bounds = array<i64: 64, 256>}]} {
    %c0 = arith.constant 0 : index
    %c0_0 = arith.constant 0 : index
    %0 = vector.load %arg2[%c0, %c0_0] : memref<64x256xbf16, #tpu.memory_space<vmem>>, vector<64x256xbf16>
    %c0_1 = arith.constant 0 : index
    %c0_2 = arith.constant 0 : index
    %c0_3 = arith.constant 0 : index
    %1 = vector.load %arg3[%c0_1, %c0_2, %c0_3] : memref<1x32x64xbf16, #tpu.memory_space<vmem>>, vector<1x32x64xbf16>
    %2 = vector.shape_cast %1 : vector<1x32x64xbf16> to vector<32x64xbf16>
    %cst = arith.constant dense<0.000000e+00> : vector<32x256xf32>
    %3 = tpu.matmul %2, %0, %cst {dimension_numbers = #tpu.dot_dimension_numbers<[1], [0], [0], [1], [0, 0, 1, 1], [], []>} : vector<32x64xbf16>, vector<64x256xbf16>, vector<32x256xf32> -> vector<32x256xf32>
    %c0_4 = arith.constant 0 : index
    %c0_5 = arith.constant 0 : index
    %c0_6 = arith.constant 0 : index
    %4 = vector.load %arg4[%c0_4, %c0_5, %c0_6] : memref<1x32x1xf32, #tpu.memory_space<vmem>>, vector<1x32x1xf32>
    %5 = vector.shape_cast %4 : vector<1x32x1xf32> to vector<32x1xf32>
    %6 = vector.broadcast %5 : vector<32x1xf32> to vector<32x256xf32>
    %7 = arith.addf %3, %6 : vector<32x256xf32>
    %cst_7 = arith.constant 1.000000e-01 : f32
    %8 = vector.broadcast %cst_7 : f32 to vector<32x256xf32>
    %9 = arith.mulf %8, %7 : vector<32x256xf32>
    %10 = arith.maximumf %7, %9 : vector<32x256xf32>
    %c0_8 = arith.constant 0 : index
    %c0_9 = arith.constant 0 : index
    %c0_10 = arith.constant 0 : index
    %11 = vector.load %arg5[%c0_8, %c0_9, %c0_10] : memref<1x64x32xbf16, #tpu.memory_space<vmem>>, vector<1x64x32xbf16>
    %12 = vector.shape_cast %11 : vector<1x64x32xbf16> to vector<64x32xbf16>
    %13 = arith.truncf %10 : vector<32x256xf32> to vector<32x256xbf16>
    %cst_11 = arith.constant dense<0.000000e+00> : vector<64x256xf32>
    %14 = tpu.matmul %12, %13, %cst_11 {dimension_numbers = #tpu.dot_dimension_numbers<[1], [0], [0], [1], [0, 0, 1, 1], [], []>} : vector<64x32xbf16>, vector<32x256xbf16>, vector<64x256xf32> -> vector<64x256xf32>
    %c0_12 = arith.constant 0 : index
    %c0_13 = arith.constant 0 : index
    %c0_14 = arith.constant 0 : index
    %15 = vector.load %arg6[%c0_12, %c0_13, %c0_14] : memref<1x64x1xf32, #tpu.memory_space<vmem>>, vector<1x64x1xf32>
    %16 = vector.shape_cast %15 : vector<1x64x1xf32> to vector<64x1xf32>
    %17 = vector.broadcast %16 : vector<64x1xf32> to vector<64x256xf32>
    %18 = arith.addf %14, %17 : vector<64x256xf32>
    %cst_15 = arith.constant 1.000000e-01 : f32
    %19 = vector.broadcast %cst_15 : f32 to vector<64x256xf32>
    %20 = arith.mulf %19, %18 : vector<64x256xf32>
    %21 = arith.maximumf %18, %20 : vector<64x256xf32>
    %22 = arith.extf %0 : vector<64x256xbf16> to vector<64x256xf32>
    %23 = arith.addf %21, %22 : vector<64x256xf32>
    %24 = arith.truncf %23 : vector<64x256xf32> to vector<64x256xbf16>
    %c0_16 = arith.constant 0 : index
    %c0_17 = arith.constant 0 : index
    %25 = vector.load %arg7[%c0_16, %c0_17] : memref<64x256xbf16, #tpu.memory_space<vmem>>, vector<64x256xbf16>
    tpu.vector_store %arg7[%c0_16, %c0_17], %24 {strides = array<i32>} : memref<64x256xbf16, #tpu.memory_space<vmem>>, vector<64x256xbf16>,
    return
  }
  func.func @transform_0(%arg0: i32, %arg1: i32) -> (i32, i32) {
    %c0_i32 = arith.constant 0 : i32
    return %arg0, %arg1 : i32, i32
  }
  func.func @transform_1(%arg0: i32, %arg1: i32) -> (i32, i32, i32) {
    %c0_i32 = arith.constant 0 : i32
    %c0_i32_0 = arith.constant 0 : i32
    %c0_i32_1 = arith.constant 0 : i32
    %c0_i32_2 = arith.constant 0 : i32
    return %c0_i32, %c0_i32_0, %c0_i32_1 : i32, i32, i32
  }
  func.func @transform_2(%arg0: i32, %arg1: i32) -> (i32, i32, i32) {
    %c0_i32 = arith.constant 0 : i32
    %c0_i32_0 = arith.constant 0 : i32
    %c0_i32_1 = arith.constant 0 : i32
    %c0_i32_2 = arith.constant 0 : i32
    return %c0_i32, %c0_i32_0, %c0_i32_1 : i32, i32, i32
  }
  func.func @transform_3(%arg0: i32, %arg1: i32) -> (i32, i32, i32) {
    %c0_i32 = arith.constant 0 : i32
    %c0_i32_0 = arith.constant 0 : i32
    %c0_i32_1 = arith.constant 0 : i32
    %c0_i32_2 = arith.constant 0 : i32
    return %c0_i32, %c0_i32_0, %c0_i32_1 : i32, i32, i32
  }
  func.func @transform_4(%arg0: i32, %arg1: i32) -> (i32, i32, i32) {
    %c0_i32 = arith.constant 0 : i32
    %c0_i32_0 = arith.constant 0 : i32
    %c0_i32_1 = arith.constant 0 : i32
    %c0_i32_2 = arith.constant 0 : i32
    return %c0_i32, %c0_i32_0, %c0_i32_1 : i32, i32, i32
  }
  func.func @transform_5(%arg0: i32, %arg1: i32) -> (i32, i32) {
    %c0_i32 = arith.constant 0 : i32
    return %arg0, %arg1 : i32, i32
  }
}

</mosaic_0001>

<bundles_post_ra>
// kernel: tpu_custom_call.1
= control target key start
LH: loop header
LB: loop body
LE: loop exit
PB: predicated region body
PF: predicated region fallthrough
CT: control target
= control target key end

     0   :  { %10 = vsyncpa [#allocation3], 0  ;;  %s1373_s0 = inlined_call_operand.vmem [shape: bf16[128,256], index: 0, kind: input, shape index: {}]   ;;  %s1374_s1 = inlined_call_operand.hbm [shape: bf16[1,32,64], index: 1, kind: input, shape index: {}]   ;;  %s1375_s2 = inlined_call_operand.vmem [shape: f32[1,32,1], index: 2, kind: input, shape index: {}]   ;;  %s1376_s3 = inlined_call_operand.vmem [shape: bf16[1,64,32], index: 3, kind: input, shape index: {}]   ;;  %s1377_s4 = inlined_call_operand.vmem [shape: f32[1,64,1], index: 4, kind: input, shape index: {}]   ;;  %s1378_s5 = inlined_call_operand.hbm [shape: bf16[128,256], index: 5, kind: output, shape index: {}]  }
   0x1   :  { %11 = vsyncpa [#allocation4], 0 }
   0x2   :  { %13 = vsyncpa [#allocation4 + $0x1], 0  ;;  %s1120_s18 = smov 0   ;;  %s1122_s19 = smov 0  }
   0x3   :  { %s1124_s20 = smov 0   ;;  %s1126_s21 = smov 0  }
   0x4   :  { %s1128_s22 = smov 0   ;;  %s1130_s23 = smov 0  }
   0x5 LB: > { %s832_s24 = sadd.s32 4294967295, %s1081_s23   ;;  %s833_s25 = sadd.s32 4294967294, %s1081_s23   ;;  %s1081_s23 = sphi %s1130_s23, %s19_s23   ;;  %s1077_s22 = sphi %s1128_s22, %s1387_s22   ;;  %s1073_s21 = sphi %s1126_s21, %s1386_s21   ;;  %s1069_s20 = sphi %s1124_s20, %s1385_s20   ;;  %s1065_s19 = sphi %s1122_s19, %s1384_s19   ;;  %s1061_s18 = sphi %s1120_s18, %s1383_s18  }
   0x6   : > { %s31_s26 = sadd.s32 1, %s1077_s22  ;;  %s152_s27 = sadd.s32 1, %s1069_s20 }
   0x7   : > { %p33_p0 = scmp.ge.s32.totalorder %s31_s26, 2  ;;  %p162_p1 = scmp.ne.s32.totalorder %s1069_s20, %s1065_s19 }
   0x8   : > { %p163_p2 = scmp.eq.s32.totalorder %s832_s24, 1  ;;  %p168_p3 = scmp.ne.s32.totalorder %s1065_s19, %s1061_s18 }
   0x9   : > { %s1389_s26 = smov (%p33_p0, %s31_s26), 0  ;;  %p169_p5 = scmp.eq.s32.totalorder %s833_s25, 1 }
   0xa   : > { %p1160_p4 = por %p163_p2, %p162_p1  ;;  %s147_s29 = ssub.s32 %s1077_s22, %s1389_s26 }
   0xb   : > { %p834_p6 = scmp.ge.s32.totalorder %s1081_s23, 1  ;;  %p150_p7 = scmp.eq.s32.totalorder %s147_s29, 0 }
   0xc   : > { %p1167_p8 = por %p169_p5, %p168_p3  ;;  %p176_p9 = scmp.lt.s32.totalorder %s1081_s23, 3 }
   0xd   : > { %s1173_s6 = scalar_select %p150_p7, %s1069_s20, %s152_s27  }
   0xe   : > { %p1175_p10 = pnand %p834_p6, %p176_p9  ;;  %p1179_p11 = scmp.eq.s32.totalorder %s832_s24, 0 }
   0xf   : > { %s1083_s9 = smov [#allocation2]  }
  0x10   : > { %p894_p12 = pneg %p1175_p10  ;;  %s188_s10 = sshll.u32 %s1083_s9, 4  ;;  %s189_s10 = int_to_ptr.vmem [resolvable:$true] %s188_s10 }
  0x11   : > { %s986_s11 = scalar_lea.vmem %s189_s10, 256  ;;  %p994_p5 = scmp.lt.s32.totalorder %s189_s10, %s189_s10 }
  0x12   : > { %p895_p13 = pnand %p1179_p11, %p894_p12  ;;  %p987_p1 = scmp.ne.s32.totalorder %s189_s10, %s986_s11 }
  0x13   : > { %p995_p6 = scmp.lt.s32.totalorder %s986_s11, %s986_s11 }
  0x14   : > { %p977_p0 = pneg %p895_p13 }
  0x15   : > { %p996_p7 = por %p995_p6, %p994_p5 }
  0x16   : > { %p989_p2 = pnand %p987_p1, %p977_p0 }
  0x18   : > { %p990_p3 = pneg %p989_p2 }
  0x1a   : > { %p997_p9 = pnand %p996_p7, %p990_p3 }
  0x1c   : > { %1000 = shalt.err (!%p997_p9)
}
  0x1d   : > { %s1084_s12 = smov 64   ;;  %s1085_s13 = smov 4  }
  0x1e   : > { %897 = dma.hbm_to_vmem [thread:$0]  (!%p895_p13), %s1374_s1, 256, %s189_s10, [#allocation3], %s1084_s12, %s1084_s12, %s1085_s13  }
  0x1f   : > { %228 = sbr.rel (%p1175_p10) target bundleno = 532 (0x214), region = 40 }
  0x24   : > { %1052 = dma.done.wait (%p1179_p11), [#allocation3], 256  }
  0x25   : > { %1054 = vsyncadd (%p1179_p11), [#allocation3], 4294967040  ;;  %s840_s16 = sshll.u32 %s1073_s21, 3  ;;  %v1086_v0 = vmov 0   ;;  %v290_v11 = vld [vmem:[%s1375_s2 + $0x10] sm:$0xff]  ;;  %v288_v13 = vld [vmem:[%s1375_s2] sm:$0xff] }
  0x26   : > { %p263_p12 = scmp.lt.s32.totalorder %s840_s16, 15  ;;  %401 = vmatprep.mubr.bf16.mxu0 %v1086_v0  ;;  %959 = vset.pattern.permute.xlu0 %v1086_v0  ;;  %v291_v16 = vld [vmem:[%s1375_s2 + $0x18] sm:$0xff]  ;;  %v289_v17 = vld [vmem:[%s1375_s2 + $0x8] sm:$0xff]  ;;  %v450_v19 = vld [vmem:[%s1377_s4] sm:$0xff]  ;;  %vm362_vm0 = vcmask 523264   ;;  %vm518_vm1 = vcmask 261120  }
  0x27   : > { %960 = vset.pattern.permute.xlu1 %v1086_v0  ;;  %563 = vmatprep.mubr.bf16.mxu1 %v1086_v0  ;;  %v451_v21 = vld [vmem:[%s1377_s4 + $0x8] sm:$0xff]  ;;  %v452_v23 = vld [vmem:[%s1377_s4 + $0x10] sm:$0xff]  ;;  %v969_v24 = vld [vmem:[#allocation2] sm:$0xff]   ;;  %s258_s8 = sand.u32 1, %s1065_s19   ;;  %s887_s11 = sshll.u32 %s1073_s21, 10 }
  0x28   : > { %s1391_s16 = smov (!%p263_p12, %s840_s16), 15  ;;  %304 = vperm.xlu0 %959, %v290_v11   ;;  %294 = vperm.xlu1 %960, %v288_v13   ;;  %v453_v25 = vld [vmem:[%s1377_s4 + $0x18] sm:$0xff]  ;;  %v454_v26 = vld [vmem:[%s1377_s4 + $0x20] sm:$0xff]  ;;  %v455_v27 = vld [vmem:[%s1377_s4 + $0x28] sm:$0xff]  ;;  %s839_s9 = sshll.u32 %s258_s8, 6 }
  0x29   : > { %s877_s17 = sshll.u32 %s1391_s16, 3  ;;  %v456_v28 = vld [vmem:[%s1377_s4 + $0x30] sm:$0xff]  ;;  %v970_v29 = vld [vmem:[#allocation2 + $0x8] sm:$0xff]   ;;  %v457_v30 = vld [vmem:[%s1377_s4 + $0x38] sm:$0xff]  ;;  %s1295_s10 = scalar_lea.vmem [#allocation5], %s839_s9 }
  0x2a   : > { %s270_s27 = scalar_lea.vmem %s1373_s0, %s877_s17  ;;  %s741_s12 = sshll.u32 %s1295_s10, 4  ;;  %s1323_s12 = int_to_ptr.vmem [resolvable:$true] %s741_s12 }
  0x2b   : > { %v1204_v1 = vld [vmem:[%s270_s27 + $0x30] sm:$0xff]  ;;  %v1206_v2 = vld [vmem:[%s270_s27 + $0x38] sm:$0xff]  ;;  %v1208_v3 = vld [vmem:[%s270_s27 + $0x20] sm:$0xff]  ;;  %s1321_s15 = scalar_lea.hbm %s1378_s5, %s887_s11  ;;  %s1328_s16 = scalar_lea.sflag [#allocation4], %s258_s8 }
  0x2c   : > { %v852_v4 = vcombine.high %v1204_v1, %v1206_v2  ;;  %v851_v5 = vcombine.low %v1204_v1, %v1206_v2  ;;  %v1214_v6 = vld [vmem:[%s270_s27 + $0x28] sm:$0xff]  ;;  %v1218_v8 = vld [vmem:[%s270_s27 + $0x10] sm:$0xff]  ;;  %v1220_v9 = vld [vmem:[%s270_s27 + $0x18] sm:$0xff]  ;;  %309 = vperm.xlu0 %959, %v291_v16   ;;  %299 = vperm.xlu1 %960, %v289_v17   ;;  %s1001_s21 = scalar_lea.vmem %s1323_s12, 1024  ;;  %s1087_s17 = smov [#allocation5]  }
  0x2d   : > { %v850_v7 = vcombine.high %v1208_v3, %v1214_v6  ;;  %v849_v10 = vcombine.low %v1208_v3, %v1214_v6  ;;  %v848_v12 = vcombine.high %v1218_v8, %v1220_v9  ;;  %v1232_v14 = vld [vmem:[%s270_s27] sm:$0xff]  ;;  %v1234_v15 = vld [vmem:[%s270_s27 + $0x8] sm:$0xff]  ;;  %v847_v18 = vcombine.low %v1218_v8, %v1220_v9  ;;  %p1002_p10 = scmp.ne.s32.totalorder %s1323_s12, %s1001_s21  ;;  %s1005_s24 = sshll.u32 %s1087_s17, 4  ;;  %s1006_s24 = int_to_ptr.vmem [resolvable:$false] %s1005_s24 }
  0x2e   : > { %377 = vmatprep.subr.bf16.mxu0 %v852_v4  ;;  %v846_v20 = vcombine.high %v1232_v14, %v1234_v15  ;;  %v845_v22 = vcombine.low %v1232_v14, %v1234_v15  ;;  %v971_v16 = vld [vmem:[%s1376_s3] sm:$0xff]   ;;  %v972_v17 = vld [vmem:[%s1376_s3 + $0x8] sm:$0xff]   ;;  %s1007_s25 = scalar_lea.vmem %s1006_s24, 2048  ;;  %p1008_p0 = scmp.lt.s32.totalorder %s1323_s12, %s1006_s24 }
  0x2f   : > { %378 = vmatpush1.bf16.msra.mxu0 %v851_v5  ;;  %p1003_p11 = pnand %p1002_p10, %p1160_p4  ;;  %p1009_p1 = scmp.lt.s32.totalorder %s1007_s25, %s1001_s21 }
  0x30   : > { %379 = vmatprep.subr.bf16.mxu0 %v850_v7  ;;  %460 = vperm.xlu0 %959, %v450_v19   ;;  %v974_v19 = vld [vmem:[%s1376_s3 + $0x18] sm:$0xff]  }
  0x31   : > { %465 = vperm.xlu1 %960, %v451_v21   ;;  %p1004_p13 = pneg %p1003_p11  ;;  %p1010_p2 = por %p1009_p1, %p1008_p0 }
  0x33   : > { %380 = vmatpush1.bf16.msra.mxu0 %v849_v10  ;;  %p1011_p3 = pnand %p1010_p2, %p1004_p13 }
  0x34   : > { %381 = vmatprep.subr.bf16.mxu0 %v848_v12  ;;  %470 = vperm.xlu0 %959, %v452_v23  }
  0x35   : > { %475 = vperm.xlu1 %960, %v453_v25  }
  0x37   : > { %382 = vmatpush1.bf16.msra.mxu0 %v847_v18  ;;  %v973_v18 = vld [vmem:[%s1376_s3 + $0x10] sm:$0xff]  }
  0x38   : > { %383 = vmatprep.subr.bf16.mxu0 %v846_v20  ;;  %480 = vperm.xlu0 %959, %v454_v26  }
  0x39   : > { %485 = vperm.xlu1 %960, %v455_v27   ;;  %v636_v27 = vunpack.c.l.bf16 %v1232_v14 }
  0x3b   : > { %384 = vmatpush1.bf16.msra.mxu0 %v845_v22 }
  0x3c   : > { %490 = vperm.xlu0 %959, %v456_v28  }
  0x3d   : > { %495 = vperm.xlu1 %960, %v457_v30  }
  0x3e   : > { %853 = vmatmul.mubr.msk.bf16.vlgmr.msra.gmra.mxu0 %vm362_vm0, %v969_v24 }
  0x3f   : > { %411 = vmatprep.mubr.bf16.mxu0 %v1086_v0 }
  0x46   : > { %854 = vmatmul.mubr.msk.bf16.gmra.mxu0 %vm362_vm0, %v970_v29 }
  0xa3   : > { %v295_v33 = vpop.permute.xlu1 %294  ;;  %v305_v35 = vpop.permute.xlu0 %304 }
  0xa7   : > { %v300_v38 = vpop.permute.xlu1 %299  ;;  %v310_v42 = vpop.permute.xlu0 %309 }
  0xab   : > { %v461_v20 = vpop.permute.xlu0 %460 }
  0xac   : > { %v466_v26 = vpop.permute.xlu1 %465 }
  0xfe   : > { %v403_v31 = vpop.f32.mrf.mxu0 }
  0xff   : > { %v404_v53 = vadd.f32 %v403_v31, %v295_v33 }
 0x100   : > { %v405_v32 = vpop.f32.mrf.mxu0 }
 0x101   : > { %v406_v45 = vadd.f32 %v405_v32, %v295_v33  ;;  %v422_v62 = vmul.f32 0.1, %v404_v53 }
 0x102   : > { %v407_v34 = vpop.f32.mrf.mxu0 }
 0x103   : > { %v408_v47 = vadd.f32 %v407_v34, %v300_v38  ;;  %v423_v55 = vmul.f32 0.1, %v406_v45  ;;  %v430_v12 = vmax.f32 %v404_v53, %v422_v62 }
 0x104   : > { %v409_v36 = vpop.f32.mrf.mxu0 }
 0x105   : > { %v410_v40 = vadd.f32 %v409_v36, %v300_v38  ;;  %v424_v57 = vmul.f32 0.1, %v408_v47  ;;  %v431_v4 = vmax.f32 %v406_v45, %v423_v55  ;;  %v471_v36 = vpop.permute.xlu0 %470  ;;  %v638_v38 = vunpack.c.l.bf16 %v1234_v15 }
 0x106   : > { %v413_v37 = vpop.f32.mrf.mxu0 }
 0x107   : > { %v414_v43 = vadd.f32 %v413_v37, %v305_v35  ;;  %v425_v49 = vmul.f32 0.1, %v410_v40  ;;  %v432_v7 = vmax.f32 %v408_v47, %v424_v57 }
 0x108   : > { %v415_v39 = vpop.f32.mrf.mxu0 }
 0x109   : > { %v416_v41 = vadd.f32 %v415_v39, %v305_v35  ;;  %v426_v54 = vmul.f32 0.1, %v414_v43  ;;  %v433_v59 = vmax.f32 %v410_v40, %v425_v49  ;;  %v446_v13 = vpack.c.bf16 %v432_v7, %v430_v12 }
 0x10a   : > { %v417_v44 = vpop.f32.mrf.mxu0  ;;  %v639_v39 = vunpack.c.h.bf16 %v1234_v15 }
 0x10b   : > { %v418_v46 = vadd.f32 %v417_v44, %v310_v42  ;;  %v427_v50 = vmul.f32 0.1, %v416_v41  ;;  %v434_v63 = vmax.f32 %v414_v43, %v426_v54  ;;  %v447_v11 = vpack.c.bf16 %v433_v59, %v431_v4 }
 0x10c   : > { %v419_v48 = vpop.f32.mrf.mxu0  ;;  %v640_v54 = vunpack.c.l.bf16 %v1218_v8 }
 0x10d   : > { %v428_v51 = vmul.f32 0.1, %v418_v46  ;;  %v420_v52 = vadd.f32 %v419_v48, %v310_v42  ;;  %v435_v60 = vmax.f32 %v416_v41, %v427_v50  ;;  %v476_v48 = vpop.permute.xlu1 %475 }
 0x10f   : > { %v429_v56 = vmul.f32 0.1, %v420_v52  ;;  %v436_v58 = vmax.f32 %v418_v46, %v428_v51 }
 0x111   : > { %v437_v61 = vmax.f32 %v420_v52, %v429_v56  ;;  %v448_v10 = vpack.c.bf16 %v436_v58, %v434_v63  ;;  %v641_v56 = vunpack.c.h.bf16 %v1218_v8  ;;  %v642_v63 = vunpack.c.l.bf16 %v1220_v9 }
 0x113   : > { %v449_v5 = vpack.c.bf16 %v437_v61, %v435_v60  ;;  %v481_v61 = vpop.permute.xlu0 %480 }
 0x115   : > { %543 = vmatprep.subr.bf16.mxu1 %v449_v5 }
 0x116   : > { %544 = vmatpush1.bf16.msra.mxu1 %v448_v10  ;;  %v643_v10 = vunpack.c.h.bf16 %v1220_v9 }
 0x117   : > { %545 = vmatprep.subr.bf16.mxu1 %v447_v11 }
 0x11a   : > { %546 = vmatpush1.bf16.msra.mxu1 %v446_v13 }
 0x11d   : > { %859 = vmatmul.mubr.msk.bf16.vlgmr.msra.gmra.mxu1 %vm518_vm1, %v971_v16 }
 0x11e   : > { %573 = vmatprep.mubr.bf16.mxu1 %v1086_v0 }
 0x125   : > { %860 = vmatmul.mubr.msk.bf16.gmra.mxu1 %vm518_vm1, %v972_v17 }
 0x126   : > { %583 = vmatprep.mubr.bf16.mxu1 %v1086_v0 }
 0x12d   : > { %861 = vmatmul.mubr.msk.bf16.gmra.mxu1 %vm518_vm1, %v973_v18 }
 0x12e   : > { %593 = vmatprep.mubr.bf16.mxu1 %v1086_v0  ;;  %v637_v0 = vunpack.c.h.bf16 %v1232_v14 }
 0x135   : > { %862 = vmatmul.mubr.msk.bf16.gmra.mxu1 %vm518_vm1, %v974_v19  ;;  %v486_v19 = vpop.permute.xlu1 %485 }
 0x1dd   : > { %v565_v21 = vpop.f32.mrf.mxu1 }
 0x1de   : > { %v566_v22 = vadd.f32 %v565_v21, %v461_v20 }
 0x1df   : > { %v567_v23 = vpop.f32.mrf.mxu1 }
 0x1e0   : > { %v604_v24 = vmul.f32 0.1, %v566_v22  ;;  %v568_v25 = vadd.f32 %v567_v23, %v461_v20  ;;  %v645_v23 = vunpack.c.h.bf16 %v1208_v3 }
 0x1e1   : > { %v569_v28 = vpop.f32.mrf.mxu1 }
 0x1e2   : > { %v620_v29 = vmax.f32 %v566_v22, %v604_v24  ;;  %v605_v30 = vmul.f32 0.1, %v568_v25  ;;  %v570_v31 = vadd.f32 %v569_v28, %v466_v26  ;;  %v644_v22 = vunpack.c.l.bf16 %v1208_v3 }
 0x1e3   : > { %v571_v32 = vpop.f32.mrf.mxu1  ;;  %v646_v3 = vunpack.c.l.bf16 %v1214_v6 }
 0x1e4   : > { %v621_v33 = vmax.f32 %v568_v25, %v605_v30  ;;  %v606_v34 = vmul.f32 0.1, %v570_v31  ;;  %v572_v35 = vadd.f32 %v571_v32, %v466_v26  ;;  %v652_v37 = vadd.f32 %v636_v27, %v620_v29 }
 0x1e5   : > { %v575_v40 = vpop.f32.mrf.mxu1 }
 0x1e6   : > { %v653_v41 = vadd.f32 %v637_v0, %v621_v33  ;;  %v622_v42 = vmax.f32 %v570_v31, %v606_v34  ;;  %v607_v43 = vmul.f32 0.1, %v572_v35  ;;  %v576_v44 = vadd.f32 %v575_v40, %v471_v36  ;;  %v491_v31 = vpop.permute.xlu0 %490 }
 0x1e7   : > { %v577_v45 = vpop.f32.mrf.mxu1 }
 0x1e8   : > { %v878_v14 = vpack.c.bf16 %v653_v41, %v652_v37  ;;  %v623_v46 = vmax.f32 %v572_v35, %v607_v43  ;;  %v608_v47 = vmul.f32 0.1, %v576_v44  ;;  %v578_v49 = vadd.f32 %v577_v45, %v471_v36 }
 0x1e9   : > { %v579_v50 = vpop.f32.mrf.mxu1  ;;  %v654_v51 = vadd.f32 %v638_v38, %v622_v42 }
 0x1ea   : > { %716 = vst [vmem:[%s1295_s10] sm:$0xff] %v878_v14  ;;  %v655_v52 = vadd.f32 %v639_v39, %v623_v46  ;;  %v580_v15 = vadd.f32 %v579_v50, %v476_v48  ;;  %v624_v53 = vmax.f32 %v576_v44, %v608_v47  ;;  %v609_v55 = vmul.f32 0.1, %v578_v49  ;;  %v496_v44 = vpop.permute.xlu1 %495 }
 0x1eb   : > { %v581_v57 = vpop.f32.mrf.mxu1  ;;  %v647_v39 = vunpack.c.h.bf16 %v1214_v6  ;;  %v648_v14 = vunpack.c.l.bf16 %v1204_v1 }
 0x1ec   : > { %v879_v58 = vpack.c.bf16 %v655_v52, %v654_v51  ;;  %v610_v59 = vmul.f32 0.1, %v580_v15  ;;  %v582_v60 = vadd.f32 %v581_v57, %v476_v48  ;;  %v625_v62 = vmax.f32 %v578_v49, %v609_v55 }
 0x1ed   : > { %v585_v4 = vpop.f32.mrf.mxu1  ;;  %v656_v12 = vadd.f32 %v640_v54, %v624_v53  ;;  %v649_v49 = vunpack.c.h.bf16 %v1204_v1  ;;  %v651_v57 = vunpack.c.h.bf16 %v1206_v2 }
 0x1ee   : > { %717 = vst [vmem:[%s1295_s10 + $0x8] sm:$0xff] %v879_v58  ;;  %v626_v5 = vmax.f32 %v580_v15, %v610_v59  ;;  %v611_v7 = vmul.f32 0.1, %v582_v60  ;;  %v586_v11 = vadd.f32 %v585_v4, %v481_v61  ;;  %v657_v13 = vadd.f32 %v641_v56, %v625_v62 }
 0x1ef   : > { %v587_v16 = vpop.f32.mrf.mxu1  ;;  %v650_v56 = vunpack.c.l.bf16 %v1206_v2 }
 0x1f0   : > { %v627_v8 = vmax.f32 %v582_v60, %v611_v7  ;;  %v612_v17 = vmul.f32 0.1, %v586_v11  ;;  %v588_v18 = vadd.f32 %v587_v16, %v481_v61  ;;  %v880_v20 = vpack.c.bf16 %v657_v13, %v656_v12 }
 0x1f1   : > { %v658_v21 = vadd.f32 %v642_v63, %v626_v5  ;;  %v589_v24 = vpop.f32.mrf.mxu1 }
 0x1f2   : > { %v659_v25 = vadd.f32 %v643_v10, %v627_v8  ;;  %v628_v26 = vmax.f32 %v586_v11, %v612_v17  ;;  %v613_v9 = vmul.f32 0.1, %v588_v18  ;;  %v590_v27 = vadd.f32 %v589_v24, %v486_v19  ;;  %718 = vst [vmem:[%s1295_s10 + $0x10] sm:$0xff] %v880_v20 }
 0x1f3   : > { %v591_v28 = vpop.f32.mrf.mxu1 }
 0x1f4   : > { %v881_v29 = vpack.c.bf16 %v659_v25, %v658_v21  ;;  %v629_v30 = vmax.f32 %v588_v18, %v613_v9  ;;  %v614_v0 = vmul.f32 0.1, %v590_v27  ;;  %v592_v32 = vadd.f32 %v591_v28, %v486_v19 }
 0x1f5   : > { %v595_v33 = vpop.f32.mrf.mxu1  ;;  %v660_v34 = vadd.f32 %v644_v22, %v628_v26 }
 0x1f6   : > { %719 = vst [vmem:[%s1295_s10 + $0x18] sm:$0xff] %v881_v29  ;;  %v661_v35 = vadd.f32 %v645_v23, %v629_v30  ;;  %v596_v36 = vadd.f32 %v595_v33, %v491_v31  ;;  %v630_v37 = vmax.f32 %v590_v27, %v614_v0  ;;  %v615_v38 = vmul.f32 0.1, %v592_v32 }
 0x1f7   : > { %v597_v40 = vpop.f32.mrf.mxu1 }
 0x1f8   : > { %v882_v41 = vpack.c.bf16 %v661_v35, %v660_v34  ;;  %v616_v42 = vmul.f32 0.1, %v596_v36  ;;  %v598_v43 = vadd.f32 %v597_v40, %v491_v31  ;;  %v631_v45 = vmax.f32 %v592_v32, %v615_v38 }
 0x1f9   : > { %v599_v46 = vpop.f32.mrf.mxu1  ;;  %v662_v51 = vadd.f32 %v646_v3, %v630_v37 }
 0x1fa   : > { %720 = vst [vmem:[%s1295_s10 + $0x20] sm:$0xff] %v882_v41  ;;  %v632_v47 = vmax.f32 %v596_v36, %v616_v42  ;;  %v617_v48 = vmul.f32 0.1, %v598_v43  ;;  %v600_v50 = vadd.f32 %v599_v46, %v496_v44  ;;  %v663_v52 = vadd.f32 %v647_v39, %v631_v45 }
 0x1fb   : > { %v601_v6 = vpop.f32.mrf.mxu1 }
 0x1fc   : > { %v633_v15 = vmax.f32 %v598_v43, %v617_v48  ;;  %v618_v53 = vmul.f32 0.1, %v600_v50  ;;  %v602_v54 = vadd.f32 %v601_v6, %v496_v44  ;;  %v883_v55 = vpack.c.bf16 %v663_v52, %v662_v51 }
 0x1fd   : > { %v664_v58 = vadd.f32 %v648_v14, %v632_v47 }
 0x1fe   : > { %v665_v59 = vadd.f32 %v649_v49, %v633_v15  ;;  %v634_v1 = vmax.f32 %v600_v50, %v618_v53  ;;  %v619_v60 = vmul.f32 0.1, %v602_v54  ;;  %721 = vst [vmem:[%s1295_s10 + $0x28] sm:$0xff] %v883_v55 }
 0x200   : > { %v884_v61 = vpack.c.bf16 %v665_v59, %v664_v58  ;;  %v635_v62 = vmax.f32 %v602_v54, %v619_v60  ;;  %v666_v63 = vadd.f32 %v650_v56, %v634_v1 }
 0x202   : > { %722 = vst [vmem:[%s1295_s10 + $0x30] sm:$0xff] %v884_v61  ;;  %v667_v4 = vadd.f32 %v651_v57, %v635_v62 }
 0x204   : > { %v885_v2 = vpack.c.bf16 %v667_v4, %v666_v63 }
 0x206   : > { %723 = vst [vmem:[%s1295_s10 + $0x38] sm:$0xff] %v885_v2 }
 0x207   : > { %1014 = shalt.err (!%p1011_p3)
}
 0x208   : > { %s1015_s27 = scalar_lea.hbm %s1321_s15, 1024  ;;  %s1019_s8 = scalar_lea.hbm %s1378_s5, 2048 }
 0x209   : > { %p1016_p5 = scmp.ne.s32.totalorder %s1321_s15, %s1015_s27  ;;  %p1020_p9 = scmp.lt.s32.totalorder %s1321_s15, %s1378_s5 }
 0x20a   : > { %p1021_p12 = scmp.lt.s32.totalorder %s1019_s8, %s1015_s27 }
 0x20b   : > { %p1017_p6 = pnand %p1016_p5, %p1160_p4 }
 0x20c   : > { %p1022_p10 = por %p1021_p12, %p1020_p9 }
 0x20d   : > { %p1018_p7 = pneg %p1017_p6 }
 0x20f   : > { %p1023_p11 = pnand %p1022_p10, %p1018_p7 }
 0x211   : > { %1026 = shalt.err (!%p1023_p11)
}
 0x212   : > { %s1088_s11 = smov 128   ;;  %s1089_s13 = smov 8  }
 0x213   : > { %892 = dma.vmem_to_hbm [thread:$0]  (%p1160_p4), %s1323_s12, 1024, %s1321_s15, %s1328_s16, %s1088_s11, %s1088_s11, %s1089_s13  }
 0x214 PF: > { %p904_p13 = scmp.ge.s32.totalorder %s1081_s23, 2  ;;  %s756_s14 = sand.u32 1, %s1061_s18  }
 0x215   : > { %s757_s21 = scalar_lea.sflag [#allocation4], %s756_s14 }
 0x216   : > { %p899_p0 = pnand %p904_p13, %p1167_p8 }
 0x218   : > { %p900_p1 = pneg %p899_p0 }
 0x21a   : > { %1056 = dma.done.wait (%p900_p1), %s757_s21, 1024  }
 0x21b   : > { %1058 = vsyncadd (%p900_p1), %s757_s21, 4294966272  ;;  %s19_s23 = sadd.s32 1, %s1081_s23   ;;  %s1383_s18 = smov %s1065_s19 }
 0x21c   : > { %p16_p2 = scmp.ge.s32.totalorder %s19_s23, 4   ;;  %s1384_s19 = smov %s1069_s20 }
 0x21d   : > { %s1385_s20 = smov %s1173_s6  ;;  %s1386_s21 = smov %s1077_s22 }
 0x21e   : > { %s1387_s22 = smov %s1389_s26  ;;  %18 = sbr.rel (!%p16_p2) target bundleno = 5 (0x5), region = 80 }
 0x223   :  { %762 = vsyncpa [#allocation3], 1 }
 0x224   :  { %764 = vsyncpa [#allocation3 + $0x1], 1 }
 0x225   :  { %765 = vsyncpa [#allocation4], 1 }
 0x226   :  { %767 = vsyncpa [#allocation4 + $0x1], 1 }

// kernel: tpu_custom_call.1
= control target key start
LH: loop header
LB: loop body
LE: loop exit
PB: predicated region body
PF: predicated region fallthrough
CT: control target
= control target key end

     0   :  { %10 = vsyncpa [#allocation3], 0  ;;  %s1373_s0 = inlined_call_operand.vmem [shape: bf16[128,256], index: 0, kind: input, shape index: {}]   ;;  %s1374_s1 = inlined_call_operand.hbm [shape: bf16[1,32,64], index: 1, kind: input, shape index: {}]   ;;  %s1375_s2 = inlined_call_operand.vmem [shape: f32[1,32,1], index: 2, kind: input, shape index: {}]   ;;  %s1376_s3 = inlined_call_operand.vmem [shape: bf16[1,64,32], index: 3, kind: input, shape index: {}]   ;;  %s1377_s4 = inlined_call_operand.vmem [shape: f32[1,64,1], index: 4, kind: input, shape index: {}]   ;;  %s1378_s5 = inlined_call_operand.hbm [shape: bf16[128,256], index: 5, kind: output, shape index: {}]  }
   0x1   :  { %11 = vsyncpa [#allocation4], 0 }
   0x2   :  { %13 = vsyncpa [#allocation4 + $0x1], 0  ;;  %s1120_s18 = smov 0   ;;  %s1122_s19 = smov 0  }
   0x3   :  { %s1124_s20 = smov 0   ;;  %s1126_s21 = smov 0  }
   0x4   :  { %s1128_s22 = smov 0   ;;  %s1130_s23 = smov 0  }
   0x5 LB: > { %s832_s24 = sadd.s32 4294967295, %s1081_s23   ;;  %s833_s25 = sadd.s32 4294967294, %s1081_s23   ;;  %s1081_s23 = sphi %s1130_s23, %s19_s23   ;;  %s1077_s22 = sphi %s1128_s22, %s1387_s22   ;;  %s1073_s21 = sphi %s1126_s21, %s1386_s21   ;;  %s1069_s20 = sphi %s1124_s20, %s1385_s20   ;;  %s1065_s19 = sphi %s1122_s19, %s1384_s19   ;;  %s1061_s18 = sphi %s1120_s18, %s1383_s18  }
   0x6   : > { %s31_s26 = sadd.s32 1, %s1077_s22  ;;  %s152_s27 = sadd.s32 1, %s1069_s20 }
   0x7   : > { %p33_p0 = scmp.ge.s32.totalorder %s31_s26, 2  ;;  %p162_p1 = scmp.ne.s32.totalorder %s1069_s20, %s1065_s19 }
   0x8   : > { %p163_p2 = scmp.eq.s32.totalorder %s832_s24, 1  ;;  %p168_p3 = scmp.ne.s32.totalorder %s1065_s19, %s1061_s18 }
   0x9   : > { %s1389_s26 = smov (%p33_p0, %s31_s26), 0  ;;  %p169_p5 = scmp.eq.s32.totalorder %s833_s25, 1 }
   0xa   : > { %p1160_p4 = por %p163_p2, %p162_p1  ;;  %s147_s29 = ssub.s32 %s1077_s22, %s1389_s26 }
   0xb   : > { %p834_p6 = scmp.ge.s32.totalorder %s1081_s23, 1  ;;  %p150_p7 = scmp.eq.s32.totalorder %s147_s29, 0 }
   0xc   : > { %p1167_p8 = por %p169_p5, %p168_p3  ;;  %p176_p9 = scmp.lt.s32.totalorder %s1081_s23, 3 }
   0xd   : > { %s1173_s6 = scalar_select %p150_p7, %s1069_s20, %s152_s27  }
   0xe   : > { %p1175_p10 = pnand %p834_p6, %p176_p9  ;;  %p1179_p11 = scmp.eq.s32.totalorder %s832_s24, 0 }
   0xf   : > { %s1083_s9 = smov [#allocation2]  }
  0x10   : > { %p894_p12 = pneg %p1175_p10  ;;  %s188_s10 = sshll.u32 %s1083_s9, 4  ;;  %s189_s10 = int_to_ptr.vmem [resolvable:$true] %s188_s10 }
  0x11   : > { %s986_s11 = scalar_lea.vmem %s189_s10, 256  ;;  %p994_p5 = scmp.lt.s32.totalorder %s189_s10, %s189_s10 }
  0x12   : > { %p895_p13 = pnand %p1179_p11, %p894_p12  ;;  %p987_p1 = scmp.ne.s32.totalorder %s189_s10, %s986_s11 }
  0x13   : > { %p995_p6 = scmp.lt.s32.totalorder %s986_s11, %s986_s11 }
  0x14   : > { %p977_p0 = pneg %p895_p13 }
  0x15   : > { %p996_p7 = por %p995_p6, %p994_p5 }
  0x16   : > { %p989_p2 = pnand %p987_p1, %p977_p0 }
  0x18   : > { %p990_p3 = pneg %p989_p2 }
  0x1a   : > { %p997_p9 = pnand %p996_p7, %p990_p3 }
  0x1c   : > { %1000 = shalt.err (!%p997_p9)
}
  0x1d   : > { %s1084_s12 = smov 64   ;;  %s1085_s13 = smov 4  }
  0x1e   : > { %897 = dma.hbm_to_vmem [thread:$0]  (!%p895_p13), %s1374_s1, 256, %s189_s10, [#allocation3], %s1084_s12, %s1084_s12, %s1085_s13  }
  0x1f   : > { %228 = sbr.rel (%p1175_p10) target bundleno = 532 (0x214), region = 40 }
  0x24   : > { %1052 = dma.done.wait (%p1179_p11), [#allocation3], 256  }
  0x25   : > { %1054 = vsyncadd (%p1179_p11), [#allocation3], 4294967040  ;;  %s840_s16 = sshll.u32 %s1073_s21, 3  ;;  %v1086_v0 = vmov 0   ;;  %v290_v11 = vld [vmem:[%s1375_s2 + $0x10] sm:$0xff]  ;;  %v288_v13 = vld [vmem:[%s1375_s2] sm:$0xff] }
  0x26   : > { %p263_p12 = scmp.lt.s32.totalorder %s840_s16, 15  ;;  %401 = vmatprep.mubr.bf16.mxu0 %v1086_v0  ;;  %959 = vset.pattern.permute.xlu0 %v1086_v0  ;;  %v291_v16 = vld [vmem:[%s1375_s2 + $0x18] sm:$0xff]  ;;  %v289_v17 = vld [vmem:[%s1375_s2 + $0x8] sm:$0xff]  ;;  %v450_v19 = vld [vmem:[%s1377_s4] sm:$0xff]  ;;  %vm362_vm0 = vcmask 523264   ;;  %vm518_vm1 = vcmask 261120  }
  0x27   : > { %960 = vset.pattern.permute.xlu1 %v1086_v0  ;;  %563 = vmatprep.mubr.bf16.mxu1 %v1086_v0  ;;  %v451_v21 = vld [vmem:[%s1377_s4 + $0x8] sm:$0xff]  ;;  %v452_v23 = vld [vmem:[%s1377_s4 + $0x10] sm:$0xff]  ;;  %v969_v24 = vld [vmem:[#allocation2] sm:$0xff]   ;;  %s258_s8 = sand.u32 1, %s1065_s19   ;;  %s887_s11 = sshll.u32 %s1073_s21, 10 }
  0x28   : > { %s1391_s16 = smov (!%p263_p12, %s840_s16), 15  ;;  %304 = vperm.xlu0 %959, %v290_v11   ;;  %294 = vperm.xlu1 %960, %v288_v13   ;;  %v453_v25 = vld [vmem:[%s1377_s4 + $0x18] sm:$0xff]  ;;  %v454_v26 = vld [vmem:[%s1377_s4 + $0x20] sm:$0xff]  ;;  %v455_v27 = vld [vmem:[%s1377_s4 + $0x28] sm:$0xff]  ;;  %s839_s9 = sshll.u32 %s258_s8, 6 }
  0x29   : > { %s877_s17 = sshll.u32 %s1391_s16, 3  ;;  %v456_v28 = vld [vmem:[%s1377_s4 + $0x30] sm:$0xff]  ;;  %v970_v29 = vld [vmem:[#allocation2 + $0x8] sm:$0xff]   ;;  %v457_v30 = vld [vmem:[%s1377_s4 + $0x38] sm:$0xff]  ;;  %s1295_s10 = scalar_lea.vmem [#allocation5], %s839_s9 }
  0x2a   : > { %s270_s27 = scalar_lea.vmem %s1373_s0, %s877_s17  ;;  %s741_s12 = sshll.u32 %s1295_s10, 4  ;;  %s1323_s12 = int_to_ptr.vmem [resolvable:$true] %s741_s12 }
  0x2b   : > { %v1204_v1 = vld [vmem:[%s270_s27 + $0x30] sm:$0xff]  ;;  %v1206_v2 = vld [vmem:[%s270_s27 + $0x38] sm:$0xff]  ;;  %v1208_v3 = vld [vmem:[%s270_s27 + $0x20] sm:$0xff]  ;;  %s1321_s15 = scalar_lea.hbm %s1378_s5, %s887_s11  ;;  %s1328_s16 = scalar_lea.sflag [#allocation4], %s258_s8 }
  0x2c   : > { %v852_v4 = vcombine.high %v1204_v1, %v1206_v2  ;;  %v851_v5 = vcombine.low %v1204_v1, %v1206_v2  ;;  %v1214_v6 = vld [vmem:[%s270_s27 + $0x28] sm:$0xff]  ;;  %v1218_v8 = vld [vmem:[%s270_s27 + $0x10] sm:$0xff]  ;;  %v1220_v9 = vld [vmem:[%s270_s27 + $0x18] sm:$0xff]  ;;  %309 = vperm.xlu0 %959, %v291_v16   ;;  %299 = vperm.xlu1 %960, %v289_v17   ;;  %s1001_s21 = scalar_lea.vmem %s1323_s12, 1024  ;;  %s1087_s17 = smov [#allocation5]  }
  0x2d   : > { %v850_v7 = vcombine.high %v1208_v3, %v1214_v6  ;;  %v849_v10 = vcombine.low %v1208_v3, %v1214_v6  ;;  %v848_v12 = vcombine.high %v1218_v8, %v1220_v9  ;;  %v1232_v14 = vld [vmem:[%s270_s27] sm:$0xff]  ;;  %v1234_v15 = vld [vmem:[%s270_s27 + $0x8] sm:$0xff]  ;;  %v847_v18 = vcombine.low %v1218_v8, %v1220_v9  ;;  %p1002_p10 = scmp.ne.s32.totalorder %s1323_s12, %s1001_s21  ;;  %s1005_s24 = sshll.u32 %s1087_s17, 4  ;;  %s1006_s24 = int_to_ptr.vmem [resolvable:$false] %s1005_s24 }
  0x2e   : > { %377 = vmatprep.subr.bf16.mxu0 %v852_v4  ;;  %v846_v20 = vcombine.high %v1232_v14, %v1234_v15  ;;  %v845_v22 = vcombine.low %v1232_v14, %v1234_v15  ;;  %v971_v16 = vld [vmem:[%s1376_s3] sm:$0xff]   ;;  %v972_v17 = vld [vmem:[%s1376_s3 + $0x8] sm:$0xff]   ;;  %s1007_s25 = scalar_lea.vmem %s1006_s24, 2048  ;;  %p1008_p0 = scmp.lt.s32.totalorder %s1323_s12, %s1006_s24 }
  0x2f   : > { %378 = vmatpush1.bf16.msra.mxu0 %v851_v5  ;;  %p1003_p11 = pnand %p1002_p10, %p1160_p4  ;;  %p1009_p1 = scmp.lt.s32.totalorder %s1007_s25, %s1001_s21 }
  0x30   : > { %379 = vmatprep.subr.bf16.mxu0 %v850_v7  ;;  %460 = vperm.xlu0 %959, %v450_v19   ;;  %v974_v19 = vld [vmem:[%s1376_s3 + $0x18] sm:$0xff]  }
  0x31   : > { %465 = vperm.xlu1 %960, %v451_v21   ;;  %p1004_p13 = pneg %p1003_p11  ;;  %p1010_p2 = por %p1009_p1, %p1008_p0 }
  0x33   : > { %380 = vmatpush1.bf16.msra.mxu0 %v849_v10  ;;  %p1011_p3 = pnand %p1010_p2, %p1004_p13 }
  0x34   : > { %381 = vmatprep.subr.bf16.mxu0 %v848_v12  ;;  %470 = vperm.xlu0 %959, %v452_v23  }
  0x35   : > { %475 = vperm.xlu1 %960, %v453_v25  }
  0x37   : > { %382 = vmatpush1.bf16.msra.mxu0 %v847_v18  ;;  %v973_v18 = vld [vmem:[%s1376_s3 + $0x10] sm:$0xff]  }
  0x38   : > { %383 = vmatprep.subr.bf16.mxu0 %v846_v20  ;;  %480 = vperm.xlu0 %959, %v454_v26  }
  0x39   : > { %485 = vperm.xlu1 %960, %v455_v27   ;;  %v636_v27 = vunpack.c.l.bf16 %v1232_v14 }
  0x3b   : > { %384 = vmatpush1.bf16.msra.mxu0 %v845_v22 }
  0x3c   : > { %490 = vperm.xlu0 %959, %v456_v28  }
  0x3d   : > { %495 = vperm.xlu1 %960, %v457_v30  }
  0x3e   : > { %853 = vmatmul.mubr.msk.bf16.vlgmr.msra.gmra.mxu0 %vm362_vm0, %v969_v24 }
  0x3f   : > { %411 = vmatprep.mubr.bf16.mxu0 %v1086_v0 }
  0x46   : > { %854 = vmatmul.mubr.msk.bf16.gmra.mxu0 %vm362_vm0, %v970_v29 }
  0xa3   : > { %v295_v33 = vpop.permute.xlu1 %294  ;;  %v305_v35 = vpop.permute.xlu0 %304 }
  0xa7   : > { %v300_v38 = vpop.permute.xlu1 %299  ;;  %v310_v42 = vpop.permute.xlu0 %309 }
  0xab   : > { %v461_v20 = vpop.permute.xlu0 %460 }
  0xac   : > { %v466_v26 = vpop.permute.xlu1 %465 }
  0xfe   : > { %v403_v31 = vpop.f32.mrf.mxu0 }
  0xff   : > { %v404_v53 = vadd.f32 %v403_v31, %v295_v33 }
 0x100   : > { %v405_v32 = vpop.f32.mrf.mxu0 }
 0x101   : > { %v406_v45 = vadd.f32 %v405_v32, %v295_v33  ;;  %v422_v62 = vmul.f32 0.1, %v404_v53 }
 0x102   : > { %v407_v34 = vpop.f32.mrf.mxu0 }
 0x103   : > { %v408_v47 = vadd.f32 %v407_v34, %v300_v38  ;;  %v423_v55 = vmul.f32 0.1, %v406_v45  ;;  %v430_v12 = vmax.f32 %v404_v53, %v422_v62 }
 0x104   : > { %v409_v36 = vpop.f32.mrf.mxu0 }
 0x105   : > { %v410_v40 = vadd.f32 %v409_v36, %v300_v38  ;;  %v424_v57 = vmul.f32 0.1, %v408_v47  ;;  %v431_v4 = vmax.f32 %v406_v45, %v423_v55  ;;  %v471_v36 = vpop.permute.xlu0 %470  ;;  %v638_v38 = vunpack.c.l.bf16 %v1234_v15 }
 0x106   : > { %v413_v37 = vpop.f32.mrf.mxu0 }
 0x107   : > { %v414_v43 = vadd.f32 %v413_v37, %v305_v35  ;;  %v425_v49 = vmul.f32 0.1, %v410_v40  ;;  %v432_v7 = vmax.f32 %v408_v47, %v424_v57 }
 0x108   : > { %v415_v39 = vpop.f32.mrf.mxu0 }
 0x109   : > { %v416_v41 = vadd.f32 %v415_v39, %v305_v35  ;;  %v426_v54 = vmul.f32 0.1, %v414_v43  ;;  %v433_v59 = vmax.f32 %v410_v40, %v425_v49  ;;  %v446_v13 = vpack.c.bf16 %v432_v7, %v430_v12 }
 0x10a   : > { %v417_v44 = vpop.f32.mrf.mxu0  ;;  %v639_v39 = vunpack.c.h.bf16 %v1234_v15 }
 0x10b   : > { %v418_v46 = vadd.f32 %v417_v44, %v310_v42  ;;  %v427_v50 = vmul.f32 0.1, %v416_v41  ;;  %v434_v63 = vmax.f32 %v414_v43, %v426_v54  ;;  %v447_v11 = vpack.c.bf16 %v433_v59, %v431_v4 }
 0x10c   : > { %v419_v48 = vpop.f32.mrf.mxu0  ;;  %v640_v54 = vunpack.c.l.bf16 %v1218_v8 }
 0x10d   : > { %v428_v51 = vmul.f32 0.1, %v418_v46  ;;  %v420_v52 = vadd.f32 %v419_v48, %v310_v42  ;;  %v435_v60 = vmax.f32 %v416_v41, %v427_v50  ;;  %v476_v48 = vpop.permute.xlu1 %475 }
 0x10f   : > { %v429_v56 = vmul.f32 0.1, %v420_v52  ;;  %v436_v58 = vmax.f32 %v418_v46, %v428_v51 }
 0x111   : > { %v437_v61 = vmax.f32 %v420_v52, %v429_v56  ;;  %v448_v10 = vpack.c.bf16 %v436_v58, %v434_v63  ;;  %v641_v56 = vunpack.c.h.bf16 %v1218_v8  ;;  %v642_v63 = vunpack.c.l.bf16 %v1220_v9 }
 0x113   : > { %v449_v5 = vpack.c.bf16 %v437_v61, %v435_v60  ;;  %v481_v61 = vpop.permute.xlu0 %480 }
 0x115   : > { %543 = vmatprep.subr.bf16.mxu1 %v449_v5 }
 0x116   : > { %544 = vmatpush1.bf16.msra.mxu1 %v448_v10  ;;  %v643_v10 = vunpack.c.h.bf16 %v1220_v9 }
 0x117   : > { %545 = vmatprep.subr.bf16.mxu1 %v447_v11 }
 0x11a   : > { %546 = vmatpush1.bf16.msra.mxu1 %v446_v13 }
 0x11d   : > { %859 = vmatmul.mubr.msk.bf16.vlgmr.msra.gmra.mxu1 %vm518_vm1, %v971_v16 }
 0x11e   : > { %573 = vmatprep.mubr.bf16.mxu1 %v1086_v0 }
 0x125   : > { %860 = vmatmul.mubr.msk.bf16.gmra.mxu1 %vm518_vm1, %v972_v17 }
 0x126   : > { %583 = vmatprep.mubr.bf16.mxu1 %v1086_v0 }
 0x12d   : > { %861 = vmatmul.mubr.msk.bf16.gmra.mxu1 %vm518_vm1, %v973_v18 }
 0x12e   : > { %593 = vmatprep.mubr.bf16.mxu1 %v1086_v0  ;;  %v637_v0 = vunpack.c.h.bf16 %v1232_v14 }
 0x135   : > { %862 = vmatmul.mubr.msk.bf16.gmra.mxu1 %vm518_vm1, %v974_v19  ;;  %v486_v19 = vpop.permute.xlu1 %485 }
 0x1dd   : > { %v565_v21 = vpop.f32.mrf.mxu1 }
 0x1de   : > { %v566_v22 = vadd.f32 %v565_v21, %v461_v20 }
 0x1df   : > { %v567_v23 = vpop.f32.mrf.mxu1 }
 0x1e0   : > { %v604_v24 = vmul.f32 0.1, %v566_v22  ;;  %v568_v25 = vadd.f32 %v567_v23, %v461_v20  ;;  %v645_v23 = vunpack.c.h.bf16 %v1208_v3 }
 0x1e1   : > { %v569_v28 = vpop.f32.mrf.mxu1 }
 0x1e2   : > { %v620_v29 = vmax.f32 %v566_v22, %v604_v24  ;;  %v605_v30 = vmul.f32 0.1, %v568_v25  ;;  %v570_v31 = vadd.f32 %v569_v28, %v466_v26  ;;  %v644_v22 = vunpack.c.l.bf16 %v1208_v3 }
 0x1e3   : > { %v571_v32 = vpop.f32.mrf.mxu1  ;;  %v646_v3 = vunpack.c.l.bf16 %v1214_v6 }
 0x1e4   : > { %v621_v33 = vmax.f32 %v568_v25, %v605_v30  ;;  %v606_v34 = vmul.f32 0.1, %v570_v31  ;;  %v572_v35 = vadd.f32 %v571_v32, %v466_v26  ;;  %v652_v37 = vadd.f32 %v636_v27, %v620_v29 }
 0x1e5   : > { %v575_v40 = vpop.f32.mrf.mxu1 }
 0x1e6   : > { %v653_v41 = vadd.f32 %v637_v0, %v621_v33  ;;  %v622_v42 = vmax.f32 %v570_v31, %v606_v34  ;;  %v607_v43 = vmul.f32 0.1, %v572_v35  ;;  %v576_v44 = vadd.f32 %v575_v40, %v471_v36  ;;  %v491_v31 = vpop.permute.xlu0 %490 }
 0x1e7   : > { %v577_v45 = vpop.f32.mrf.mxu1 }
 0x1e8   : > { %v878_v14 = vpack.c.bf16 %v653_v41, %v652_v37  ;;  %v623_v46 = vmax.f32 %v572_v35, %v607_v43  ;;  %v608_v47 = vmul.f32 0.1, %v576_v44  ;;  %v578_v49 = vadd.f32 %v577_v45, %v471_v36 }
 0x1e9   : > { %v579_v50 = vpop.f32.mrf.mxu1  ;;  %v654_v51 = vadd.f32 %v638_v38, %v622_v42 }
 0x1ea   : > { %716 = vst [vmem:[%s1295_s10] sm:$0xff] %v878_v14  ;;  %v655_v52 = vadd.f32 %v639_v39, %v623_v46  ;;  %v580_v15 = vadd.f32 %v579_v50, %v476_v48  ;;  %v624_v53 = vmax.f32 %v576_v44, %v608_v47  ;;  %v609_v55 = vmul.f32 0.1, %v578_v49  ;;  %v496_v44 = vpop.permute.xlu1 %495 }
 0x1eb   : > { %v581_v57 = vpop.f32.mrf.mxu1  ;;  %v647_v39 = vunpack.c.h.bf16 %v1214_v6  ;;  %v648_v14 = vunpack.c.l.bf16 %v1204_v1 }
 0x1ec   : > { %v879_v58 = vpack.c.bf16 %v655_v52, %v654_v51  ;;  %v610_v59 = vmul.f32 0.1, %v580_v15  ;;  %v582_v60 = vadd.f32 %v581_v57, %v476_v48  ;;  %v625_v62 = vmax.f32 %v578_v49, %v609_v55 }
 0x1ed   : > { %v585_v4 = vpop.f32.mrf.mxu1  ;;  %v656_v12 = vadd.f32 %v640_v54, %v624_v53  ;;  %v649_v49 = vunpack.c.h.bf16 %v1204_v1  ;;  %v651_v57 = vunpack.c.h.bf16 %v1206_v2 }
 0x1ee   : > { %717 = vst [vmem:[%s1295_s10 + $0x8] sm:$0xff] %v879_v58  ;;  %v626_v5 = vmax.f32 %v580_v15, %v610_v59  ;;  %v611_v7 = vmul.f32 0.1, %v582_v60  ;;  %v586_v11 = vadd.f32 %v585_v4, %v481_v61  ;;  %v657_v13 = vadd.f32 %v641_v56, %v625_v62 }
 0x1ef   : > { %v587_v16 = vpop.f32.mrf.mxu1  ;;  %v650_v56 = vunpack.c.l.bf16 %v1206_v2 }
 0x1f0   : > { %v627_v8 = vmax.f32 %v582_v60, %v611_v7  ;;  %v612_v17 = vmul.f32 0.1, %v586_v11  ;;  %v588_v18 = vadd.f32 %v587_v16, %v481_v61  ;;  %v880_v20 = vpack.c.bf16 %v657_v13, %v656_v12 }
 0x1f1   : > { %v658_v21 = vadd.f32 %v642_v63, %v626_v5  ;;  %v589_v24 = vpop.f32.mrf.mxu1 }
 0x1f2   : > { %v659_v25 = vadd.f32 %v643_v10, %v627_v8  ;;  %v628_v26 = vmax.f32 %v586_v11, %v612_v17  ;;  %v613_v9 = vmul.f32 0.1, %v588_v18  ;;  %v590_v27 = vadd.f32 %v589_v24, %v486_v19  ;;  %718 = vst [vmem:[%s1295_s10 + $0x10] sm:$0xff] %v880_v20 }
 0x1f3   : > { %v591_v28 = vpop.f32.mrf.mxu1 }
 0x1f4   : > { %v881_v29 = vpack.c.bf16 %v659_v25, %v658_v21  ;;  %v629_v30 = vmax.f32 %v588_v18, %v613_v9  ;;  %v614_v0 = vmul.f32 0.1, %v590_v27  ;;  %v592_v32 = vadd.f32 %v591_v28, %v486_v19 }
 0x1f5   : > { %v595_v33 = vpop.f32.mrf.mxu1  ;;  %v660_v34 = vadd.f32 %v644_v22, %v628_v26 }
 0x1f6   : > { %719 = vst [vmem:[%s1295_s10 + $0x18] sm:$0xff] %v881_v29  ;;  %v661_v35 = vadd.f32 %v645_v23, %v629_v30  ;;  %v596_v36 = vadd.f32 %v595_v33, %v491_v31  ;;  %v630_v37 = vmax.f32 %v590_v27, %v614_v0  ;;  %v615_v38 = vmul.f32 0.1, %v592_v32 }
 0x1f7   : > { %v597_v40 = vpop.f32.mrf.mxu1 }
 0x1f8   : > { %v882_v41 = vpack.c.bf16 %v661_v35, %v660_v34  ;;  %v616_v42 = vmul.f32 0.1, %v596_v36  ;;  %v598_v43 = vadd.f32 %v597_v40, %v491_v31  ;;  %v631_v45 = vmax.f32 %v592_v32, %v615_v38 }
 0x1f9   : > { %v599_v46 = vpop.f32.mrf.mxu1  ;;  %v662_v51 = vadd.f32 %v646_v3, %v630_v37 }
 0x1fa   : > { %720 = vst [vmem:[%s1295_s10 + $0x20] sm:$0xff] %v882_v41  ;;  %v632_v47 = vmax.f32 %v596_v36, %v616_v42  ;;  %v617_v48 = vmul.f32 0.1, %v598_v43  ;;  %v600_v50 = vadd.f32 %v599_v46, %v496_v44  ;;  %v663_v52 = vadd.f32 %v647_v39, %v631_v45 }
 0x1fb   : > { %v601_v6 = vpop.f32.mrf.mxu1 }
 0x1fc   : > { %v633_v15 = vmax.f32 %v598_v43, %v617_v48  ;;  %v618_v53 = vmul.f32 0.1, %v600_v50  ;;  %v602_v54 = vadd.f32 %v601_v6, %v496_v44  ;;  %v883_v55 = vpack.c.bf16 %v663_v52, %v662_v51 }
 0x1fd   : > { %v664_v58 = vadd.f32 %v648_v14, %v632_v47 }
 0x1fe   : > { %v665_v59 = vadd.f32 %v649_v49, %v633_v15  ;;  %v634_v1 = vmax.f32 %v600_v50, %v618_v53  ;;  %v619_v60 = vmul.f32 0.1, %v602_v54  ;;  %721 = vst [vmem:[%s1295_s10 + $0x28] sm:$0xff] %v883_v55 }
 0x200   : > { %v884_v61 = vpack.c.bf16 %v665_v59, %v664_v58  ;;  %v635_v62 = vmax.f32 %v602_v54, %v619_v60  ;;  %v666_v63 = vadd.f32 %v650_v56, %v634_v1 }
 0x202   : > { %722 = vst [vmem:[%s1295_s10 + $0x30] sm:$0xff] %v884_v61  ;;  %v667_v4 = vadd.f32 %v651_v57, %v635_v62 }
 0x204   : > { %v885_v2 = vpack.c.bf16 %v667_v4, %v666_v63 }
 0x206   : > { %723 = vst [vmem:[%s1295_s10 + $0x38] sm:$0xff] %v885_v2 }
 0x207   : > { %1014 = shalt.err (!%p1011_p3)
}
 0x208   : > { %s1015_s27 = scalar_lea.hbm %s1321_s15, 1024  ;;  %s1019_s8 = scalar_lea.hbm %s1378_s5, 2048 }
 0x209   : > { %p1016_p5 = scmp.ne.s32.totalorder %s1321_s15, %s1015_s27  ;;  %p1020_p9 = scmp.lt.s32.totalorder %s1321_s15, %s1378_s5 }
 0x20a   : > { %p1021_p12 = scmp.lt.s32.totalorder %s1019_s8, %s1015_s27 }
 0x20b   : > { %p1017_p6 = pnand %p1016_p5, %p1160_p4 }
 0x20c   : > { %p1022_p10 = por %p1021_p12, %p1020_p9 }
 0x20d   : > { %p1018_p7 = pneg %p1017_p6 }
 0x20f   : > { %p1023_p11 = pnand %p1022_p10, %p1018_p7 }
 0x211   : > { %1026 = shalt.err (!%p1023_p11)
}
 0x212   : > { %s1088_s11 = smov 128   ;;  %s1089_s13 = smov 8  }
 0x213   : > { %892 = dma.vmem_to_hbm [thread:$0]  (%p1160_p4), %s1323_s12, 1024, %s1321_s15, %s1328_s16, %s1088_s11, %s1088_s11, %s1089_s13  }
 0x214 PF: > { %p904_p13 = scmp.ge.s32.totalorder %s1081_s23, 2  ;;  %s756_s14 = sand.u32 1, %s1061_s18  }
 0x215   : > { %s757_s21 = scalar_lea.sflag [#allocation4], %s756_s14 }
 0x216   : > { %p899_p0 = pnand %p904_p13, %p1167_p8 }
 0x218   : > { %p900_p1 = pneg %p899_p0 }
 0x21a   : > { %1056 = dma.done.wait (%p900_p1), %s757_s21, 1024  }
 0x21b   : > { %1058 = vsyncadd (%p900_p1), %s757_s21, 4294966272  ;;  %s19_s23 = sadd.s32 1, %s1081_s23   ;;  %s1383_s18 = smov %s1065_s19 }
 0x21c   : > { %p16_p2 = scmp.ge.s32.totalorder %s19_s23, 4   ;;  %s1384_s19 = smov %s1069_s20 }
 0x21d   : > { %s1385_s20 = smov %s1173_s6  ;;  %s1386_s21 = smov %s1077_s22 }
 0x21e   : > { %s1387_s22 = smov %s1389_s26  ;;  %18 = sbr.rel (!%p16_p2) target bundleno = 5 (0x5), region = 80 }
 0x223   :  { %762 = vsyncpa [#allocation3], 1 }
 0x224   :  { %764 = vsyncpa [#allocation3 + $0x1], 1 }
 0x225   :  { %765 = vsyncpa [#allocation4], 1 }
 0x226   :  { %767 = vsyncpa [#allocation4 + $0x1], 1 }

</bundles_post_ra>
